<compile_context>
chip_gen: v6e
topology: v6e:2x2x1
jax: 0.10.0
libtpu: 0.0.40
codegen_flags: <defaults>
</compile_context>

<pallas_src>
import functools

import jax
import jax.numpy as jnp
from jax.experimental import pallas as pl
from jax.experimental.pallas import tpu as pltpu


def highway_kernel(x_ref, w_ref, b_ref, o_ref):
    E = x_ref.shape[-1]
    x_f32 = x_ref[...].astype(jnp.float32)

    # Single fused MXU pass: (TM, E) @ (E, 2E) -> (TM, 2E), f32 accumulate.
    y = jnp.dot(x_f32.astype(jnp.bfloat16), w_ref[...],
                preferred_element_type=jnp.float32)
    y = y + b_ref[...]                         # (1, 2E) bias broadcasts over rows

    x_proj = jnp.maximum(y[:, :E], 0.0)        # relu(projection)
    x_gate = jax.nn.sigmoid(y[:, E:])          # sigmoid(gate)

    # Highway combine in f32, single cast on the store (lane-dense output).
    o_ref[...] = (x_gate * x_proj + (1.0 - x_gate) * x_f32).astype(o_ref.dtype)


@functools.partial(jax.jit, static_argnames=("tm",))
def highway_forward(x, w_proj, b_proj, w_gate, b_gate, *, tm=None):
    """x: (B, E) f32; w_*: (E, E) pre-transposed for x @ W; b_*: (1, E)."""
    B, E = x.shape

    # Fuse the two linears: (E, 2E) bf16 weight + (1, 2E) f32 bias.
    w_cat = jnp.concatenate([w_proj, w_gate], axis=1).astype(jnp.bfloat16)
    b_cat = jnp.concatenate([b_proj, b_gate], axis=1).astype(jnp.float32)

    if tm is None:
        tm = min(B, 256)                       # fill a v6e/v7x 256-row MXU pass
    grid = (pl.cdiv(B, tm),)

    # Explicit scoped-VMEM budget: resident fused weights + double-buffered
    # x/out tiles (+ the (TM, 2E) f32 accumulator), with 2x headroom.
    itemsize = x.dtype.itemsize
    needed = (2 * (w_cat.size * 2 + b_cat.size * 4)   # weights/bias (2 bufs)
              + 2 * tm * E * itemsize                 # x tiles (double-buffered)
              + 2 * tm * E * itemsize                 # out tiles (double-buffered)
              + tm * 2 * E * 4)                       # f32 matmul result
    vmem_limit = int(min(max(2 * needed, 16 * 1024 * 1024), 64 * 1024 * 1024))

    cost = pl.CostEstimate(
        flops=2 * B * E * (2 * E) + 8 * B * E,        # fused matmul + elementwise
        transcendentals=B * E,                        # sigmoid
        bytes_accessed=(x.size * itemsize + w_cat.size * 2
                        + b_cat.size * 4 + B * E * itemsize),
    )

    return pl.pallas_call(
        highway_kernel,
        out_shape=jax.ShapeDtypeStruct((B, E), x.dtype),
        grid_spec=pltpu.PrefetchScalarGridSpec(
            num_scalar_prefetch=0,
            grid=grid,
            in_specs=[
                pl.BlockSpec((tm, E), lambda i: (i, 0)),       # x tile (pipelined)
                pl.BlockSpec((E, 2 * E), lambda i: (0, 0)),    # fused W (resident)
                pl.BlockSpec((1, 2 * E), lambda i: (0, 0)),    # fused bias (resident)
            ],
            out_specs=pl.BlockSpec((tm, E), lambda i: (i, 0)),
        ),
        compiler_params=pltpu.CompilerParams(
            dimension_semantics=("parallel",),
            vmem_limit_bytes=vmem_limit,
        ),
        cost_estimate=cost,
    )(x, w_cat, b_cat)


def reference_forward(x, w_proj, b_proj, w_gate, b_gate):
    # Mirror the kernel's numerics: bf16 MXU operands, f32 accumulate / tail.
    xb = x.astype(jnp.bfloat16)
    proj = jnp.dot(xb, w_proj.astype(jnp.bfloat16),
                   preferred_element_type=jnp.float32) + b_proj
    gate = jnp.dot(xb, w_gate.astype(jnp.bfloat16),
                   preferred_element_type=jnp.float32) + b_gate
    x_proj = jax.nn.relu(proj)
    x_gate = jax.nn.sigmoid(gate)
    return x_gate * x_proj + (1.0 - x_gate) * x


if __name__ == "__main__":
    embed_size = 128
    batch_size = 8
    dropout_rate = 0.3  # unused in inference mode

    key = jax.random.PRNGKey(0)
    kx, kwp, kbp, kwg, kbg = jax.random.split(key, 5)

    # Deterministic parameter init (shapes as in nn.Linear(embed, embed)).
    bound = 1.0 / (embed_size ** 0.5)
    x = jax.random.normal(kx, (batch_size, embed_size), dtype=jnp.float32)
    w_proj = jax.random.uniform(kwp, (embed_size, embed_size), jnp.float32, -bound, bound)
    b_proj = jax.random.uniform(kbp, (1, embed_size), jnp.float32, -bound, bound)
    w_gate = jax.random.uniform(kwg, (embed_size, embed_size), jnp.float32, -bound, bound)
    b_gate = jax.random.uniform(kbg, (1, embed_size), jnp.float32, -bound, bound)

    out = highway_forward(x, w_proj, b_proj, w_gate, b_gate)
    out = jax.block_until_ready(out)

    ref = reference_forward(x, w_proj, b_proj, w_gate, b_gate)
    assert out.shape == (batch_size, embed_size)
    assert jnp.allclose(out, ref, atol=1e-2, rtol=1e-2), "mismatch vs reference"

    print("KERNEL_OK")
</pallas_src>

<mosaic_0001>
module attributes {stable_mosaic.version = 11 : i64} {
  func.func @highway_kernel(%arg0: i32, %arg1: memref<8x128xf32, #tpu.memory_space<vmem>>, %arg2: memref<128x256xbf16, #tpu.memory_space<vmem>>, %arg3: memref<1x256xf32, #tpu.memory_space<vmem>>, %arg4: memref<8x128xf32, #tpu.memory_space<vmem>>) attributes {dimension_semantics = [#tpu.dimension_semantics<parallel>], iteration_bounds = array<i64: 1>, scalar_prefetch = 0 : i64, scratch_operands = 0 : i64, tpu.core_type = #tpu.core_type<tc>, window_params = [{transform_indices = @transform_0, window_bounds = array<i64: 8, 128>}, {pipeline_mode = #tpu.pipeline_mode<synchronous>, transform_indices = @transform_1, window_bounds = array<i64: 128, 256>}, {pipeline_mode = #tpu.pipeline_mode<synchronous>, transform_indices = @transform_2, window_bounds = array<i64: 1, 256>}, {transform_indices = @transform_3, window_bounds = array<i64: 8, 128>}]} {
    %c0 = arith.constant 0 : index
    %c0_0 = arith.constant 0 : index
    %0 = vector.load %arg1[%c0, %c0_0] : memref<8x128xf32, #tpu.memory_space<vmem>>, vector<8x128xf32>
    %1 = arith.truncf %0 : vector<8x128xf32> to vector<8x128xbf16>
    %c0_1 = arith.constant 0 : index
    %c0_2 = arith.constant 0 : index
    %2 = vector.load %arg2[%c0_1, %c0_2] : memref<128x256xbf16, #tpu.memory_space<vmem>>, vector<128x256xbf16>
    %cst = arith.constant dense<0.000000e+00> : vector<8x256xf32>
    %3 = tpu.matmul %1, %2, %cst {dimension_numbers = #tpu.dot_dimension_numbers<[1], [0], [0], [1], [0, 0, 1, 1], [], []>} : vector<8x128xbf16>, vector<128x256xbf16>, vector<8x256xf32> -> vector<8x256xf32>
    %c0_3 = arith.constant 0 : index
    %c0_4 = arith.constant 0 : index
    %4 = vector.load %arg3[%c0_3, %c0_4] : memref<1x256xf32, #tpu.memory_space<vmem>>, vector<1x256xf32>
    %5 = vector.broadcast %4 : vector<1x256xf32> to vector<8x256xf32>
    %6 = arith.addf %3, %5 : vector<8x256xf32>
    %7 = vector.extract_strided_slice %6 {offsets = [0, 0], sizes = [8, 128], strides = [1, 1]} : vector<8x256xf32> to vector<8x128xf32>
    %cst_5 = arith.constant 0.000000e+00 : f32
    %8 = vector.broadcast %cst_5 : f32 to vector<8x128xf32>
    %9 = arith.maximumf %7, %8 : vector<8x128xf32>
    %10 = vector.extract_strided_slice %6 {offsets = [0, 128], sizes = [8, 128], strides = [1, 1]} : vector<8x256xf32> to vector<8x128xf32>
    %11 = arith.negf %10 : vector<8x128xf32>
    %12 = math.exp %11 : vector<8x128xf32>
    %cst_6 = arith.constant 1.000000e+00 : f32
    %13 = vector.broadcast %cst_6 : f32 to vector<8x128xf32>
    %14 = arith.addf %13, %12 : vector<8x128xf32>
    %15 = arith.divf %13, %14 : vector<8x128xf32>
    %16 = arith.mulf %15, %9 : vector<8x128xf32>
    %cst_7 = arith.constant 1.000000e+00 : f32
    %17 = vector.broadcast %cst_7 : f32 to vector<8x128xf32>
    %18 = arith.subf %17, %15 : vector<8x128xf32>
    %19 = arith.mulf %18, %0 : vector<8x128xf32>
    %20 = arith.addf %16, %19 : vector<8x128xf32>
    %c0_8 = arith.constant 0 : index
    %c0_9 = arith.constant 0 : index
    %21 = vector.load %arg4[%c0_8, %c0_9] : memref<8x128xf32, #tpu.memory_space<vmem>>, vector<8x128xf32>
    tpu.vector_store %arg4[%c0_8, %c0_9], %20 {strides = array<i32>} : memref<8x128xf32, #tpu.memory_space<vmem>>, vector<8x128xf32>,
    return
  }
  func.func @transform_0(%arg0: i32) -> (i32, i32) {
    %c0_i32 = arith.constant 0 : i32
    %c0_i32_0 = arith.constant 0 : i32
    return %arg0, %c0_i32 : i32, i32
  }
  func.func @transform_1(%arg0: i32) -> (i32, i32) {
    %c0_i32 = arith.constant 0 : i32
    %c0_i32_0 = arith.constant 0 : i32
    %c0_i32_1 = arith.constant 0 : i32
    return %c0_i32, %c0_i32_0 : i32, i32
  }
  func.func @transform_2(%arg0: i32) -> (i32, i32) {
    %c0_i32 = arith.constant 0 : i32
    %c0_i32_0 = arith.constant 0 : i32
    %c0_i32_1 = arith.constant 0 : i32
    return %c0_i32, %c0_i32_0 : i32, i32
  }
  func.func @transform_3(%arg0: i32) -> (i32, i32) {
    %c0_i32 = arith.constant 0 : i32
    %c0_i32_0 = arith.constant 0 : i32
    return %arg0, %c0_i32 : i32, i32
  }
}

</mosaic_0001>

<bundles_post_ra>
// kernel: highway_forward.1
= control target key start
LH: loop header
LB: loop body
LE: loop exit
PB: predicated region body
PF: predicated region fallthrough
CT: control target
= control target key end

     0   :  { %v262_v2 = vmov 0   ;;  %s341_s0 = inlined_call_operand.vmem [shape: f32[8,128], index: 0, kind: input, shape index: {}]   ;;  %s342_s1 = inlined_call_operand.vmem [shape: bf16[128,256], index: 1, kind: input, shape index: {}]   ;;  %s343_s2 = inlined_call_operand.vmem [shape: f32[1,256], index: 2, kind: input, shape index: {}]   ;;  %s344_s3 = inlined_call_operand.hbm [shape: f32[8,128], index: 3, kind: output, shape index: {}]  }
   0x1   :  { %v212_v0 = vld [vmem:[%s342_s1 + $0x74] ss:$8 sps:$4 sm:$0xff]   ;;  %v214_v1 = vld [vmem:[%s342_s1 + $0x70] ss:$8 sps:$4 sm:$0xff]   ;;  %158 = vmatprep.mubr.bf16.mxu0 %v262_v2  ;;  %v215_v3 = vld [vmem:[%s342_s1 + $0x64] ss:$8 sps:$4 sm:$0xff]  }
   0x2   :  { %126 = vmatprep.subr.bf16.mxu0 %v212_v0  ;;  %v217_v4 = vld [vmem:[%s342_s1 + $0x60] ss:$8 sps:$4 sm:$0xff]   ;;  %v218_v5 = vld [vmem:[%s342_s1 + $0x54] ss:$8 sps:$4 sm:$0xff]   ;;  %v220_v6 = vld [vmem:[%s342_s1 + $0x50] ss:$8 sps:$4 sm:$0xff]  }
   0x3   :  { %127 = vmatpush1.bf16.msra.mxu0 %v214_v1  ;;  %v221_v7 = vld [vmem:[%s342_s1 + $0x44] ss:$8 sps:$4 sm:$0xff]   ;;  %v223_v8 = vld [vmem:[%s342_s1 + $0x40] ss:$8 sps:$4 sm:$0xff]  }
   0x4   :  { %128 = vmatprep.subr.bf16.mxu0 %v215_v3 }
   0x7   :  { %129 = vmatpush1.bf16.msra.mxu0 %v217_v4 }
   0x8   :  { %130 = vmatprep.subr.bf16.mxu0 %v218_v5 }
   0xb   :  { %131 = vmatpush1.bf16.msra.mxu0 %v220_v6 }
   0xc   :  { %8 = vsyncpa [#allocation3], 0  ;;  %132 = vmatprep.subr.bf16.mxu0 %v221_v7  ;;  %v224_v9 = vld [vmem:[%s342_s1 + $0x34] ss:$8 sps:$4 sm:$0xff]   ;;  %v226_v10 = vld [vmem:[%s342_s1 + $0x30] ss:$8 sps:$4 sm:$0xff]   ;;  %v36_v19 = vlaneseq }
   0xd   :  { %v227_v11 = vld [vmem:[%s342_s1 + $0x24] ss:$8 sps:$4 sm:$0xff]   ;;  %v229_v12 = vld [vmem:[%s342_s1 + $0x20] ss:$8 sps:$4 sm:$0xff]   ;;  %v230_v13 = vld [vmem:[%s342_s1 + $0x14] ss:$8 sps:$4 sm:$0xff]  }
   0xe   :  { %v232_v14 = vld [vmem:[%s342_s1 + $0x10] ss:$8 sps:$4 sm:$0xff]   ;;  %v233_v15 = vld [vmem:[%s342_s1 + $0x4] ss:$8 sps:$4 sm:$0xff]   ;;  %v235_v16 = vld [vmem:[%s342_s1] ss:$8 sps:$4 sm:$0xff]  }
   0xf   :  { %133 = vmatpush1.bf16.msra.mxu0 %v223_v8  ;;  %v16_v17 = vld [vmem:[%s341_s0] sm:$0xff]  ;;  %v37_v20 = vshrl.u32 %v36_v19, 7  ;;  %s263_s0 = smov [#allocation2]  }
  0x10   :  { %134 = vmatprep.subr.bf16.mxu0 %v224_v9  ;;  %v17_v18 = vpack.c.bf16 %v16_v17, %v16_v17  ;;  %v34_v22 = vld [vmem:[%s343_s2] sm:$0x3]  ;;  %s185_s1 = sshll.u32 %s263_s0, 4  ;;  %s186_s1 = int_to_ptr.vmem [resolvable:$true] %s185_s1 }
  0x11   :  { %v42_v21 = vsub.s32 1, %v37_v20  ;;  %v38_v32 = vsub.s32 0, %v37_v20  ;;  %s240_s2 = scalar_lea.vmem %s186_s1, 128  ;;  %p245_p1 = scmp.lt.s32.totalorder %s186_s1, %s186_s1 }
  0x12   :  { %p241_p0 = scmp.ne.s32.totalorder %s186_s1, %s240_s2  ;;  %p246_p2 = scmp.lt.s32.totalorder %s240_s2, %s240_s2 }
  0x13   :  { %135 = vmatpush1.bf16.msra.mxu0 %v226_v10  ;;  %v43_v23 = vrot.slane %v34_v22, %v42_v21  ;;  %v39_v33 = vrot.slane %v34_v22, %v38_v32 }
  0x14   :  { %136 = vmatprep.subr.bf16.mxu0 %v227_v11  ;;  %p247_p3 = por %p246_p2, %p245_p1 }
  0x16   :  { %p248_p4 = pnand %p247_p3, %p241_p0 }
  0x17   :  { %137 = vmatpush1.bf16.msra.mxu0 %v229_v12 }
  0x18   :  { %138 = vmatprep.subr.bf16.mxu0 %v230_v13 }
  0x1b   :  { %139 = vmatpush1.bf16.msra.mxu0 %v232_v14 }
  0x1c   :  { %140 = vmatprep.subr.bf16.mxu0 %v233_v15 }
  0x1f   :  { %141 = vmatpush1.bf16.msra.mxu0 %v235_v16 }
  0x22   :  { %159 = vmatmul.mubr.bf16.vlgmr.msra.gmra.mxu0 %v17_v18 }
  0xe2   :  { %v160_v24 = vpop.f32.mrf.mxu0 }
  0xe3   :  { %v161_v34 = vadd.f32 %v160_v24, %v39_v33 }
  0xe4   :  { %v162_v25 = vpop.f32.mrf.mxu0 }
  0xe5   :  { %v163_v26 = vadd.f32 %v162_v25, %v43_v23  ;;  %v167_v36 = vmax.f32 %v161_v34, 0.0 }
  0xe6   :  { %v164_v27 = vpop.f32.mrf.mxu0 }
  0xe7   :  { %v209_v28 = vmul.f32 -1.442695, %v163_v26 }
  0xe8   :  { %v165_v29 = vpop.f32.mrf.mxu0 }
  0xe9   :  { %236 = vpow2.f32 %v209_v28 }
  0xf6   :  { %v237_v30 = vpop.eup %236 }
  0xf7   :  { %v171_v31 = vadd.f32 1.0, %v237_v30 }
  0xf9   :  { %238 = vrcp.f32 %v171_v31 }
 0x106   :  { %v239_v35 = vpop.eup %238 }
 0x107   :  { %v175_v37 = vsub.f32 1.0, %v239_v35  ;;  %v174_v38 = vmul.f32 %v239_v35, %v167_v36 }
 0x109   :  { %v176_v39 = vmul.f32 %v175_v37, %v16_v17 }
 0x10b   :  { %v177_v40 = vadd.f32 %v176_v39, %v174_v38 }
 0x10d   :  { %178 = vst [vmem:[#allocation2] sm:$0xff] %v177_v40 }
 0x10e   :  { %251 = shalt.err (!%p248_p4)
}
 0x10f   :  { %188 = dma.vmem_to_hbm [thread:$0]  %s186_s1, 128, %s344_s3, [#allocation3]  }
 0x110   :  { %260 = dma.done.wait [#allocation3], 128  }
 0x111   :  { %261 = vsyncadd [#allocation3], 4294967168 }
 0x112   :  { %192 = vsyncpa [#allocation3], 1 }

</bundles_post_ra>
